<compile_context>
chip_gen: v6e
topology: v6e:2x2x1
jax: 0.10.0
libtpu: 0.0.40
codegen_flags: <defaults>
</compile_context>

<pallas_src>
import jax
import jax.numpy as jnp
from jax import lax
from jax.experimental import pallas as pl
from jax.experimental.pallas import tpu as pltpu

# Problem sizes (in_channels must be even).
B, C, H, W = 2, 8, 16, 16
C2 = C // 2
EPS = 1e-5          # BatchNorm2d default eps
NEG_SLOPE = 0.1     # LeakyReLU slope


def _leaky(v):
    return jnp.where(v > 0, v, NEG_SLOPE * v)


def residual_kernel(x_ref, w1_ref, b1_ref, sh_ref, w2_ref, b2_ref, o_ref):
    """Whole-batch Residual block on a lane-dense layout.

    x_ref  : (B*H, W*C)       input rows, lane index = w*C + c
    w1_ref : (W*C, W*C2)      block-diagonal 1x1 conv weight (BN scale folded)
    b1_ref : (1, W*C2)        per-lane bias after conv1 (BN folded)
    sh_ref : (2, B*H, B*H)    vertical shift matrices (up, down), 0/1 entries,
                              zero across image boundaries
    w2_ref : (3, W*C2, W*C)   banded 3x3 conv weights per vertical tap
                              (horizontal taps + BN scale folded in)
    b2_ref : (1, W*C)         per-lane bias after conv2 (BN folded)
    o_ref  : (B*H, W*C)
    """
    x = x_ref[...]                                                  # (BH, W*C)

    # --- Conv #1: 1x1 conv + folded BN as one block-diagonal matmul, LeakyReLU.
    h1 = jnp.dot(x, w1_ref[...], preferred_element_type=jnp.float32)
    h1 = _leaky(h1 + b1_ref[...])                                   # (BH, W*C2)

    # --- Conv #2: 3x3 SAME conv + folded BN.
    # Vertical taps: rows shifted up/down (zeroed at image boundaries) via
    # exact 0/1 matmuls; horizontal taps are inside the banded matrices.
    up = jnp.dot(sh_ref[0], h1, preferred_element_type=jnp.float32)  # row h-1
    dn = jnp.dot(sh_ref[1], h1, preferred_element_type=jnp.float32)  # row h+1
    acc = jnp.dot(up, w2_ref[0], preferred_element_type=jnp.float32)
    acc = acc + jnp.dot(h1, w2_ref[1], preferred_element_type=jnp.float32)
    acc = acc + jnp.dot(dn, w2_ref[2], preferred_element_type=jnp.float32)
    h2 = _leaky(acc + b2_ref[...])                                  # (BH, W*C)

    # --- Additive skip connection; single unmasked lane-dense store.
    o_ref[...] = (h2 + x).astype(o_ref.dtype)


def _fold_bn(gamma, beta, mean, var):
    scale = gamma * lax.rsqrt(var + EPS)
    bias = beta - mean * scale
    return scale, bias


def prepare_params(w1, w2, s1, b1, s2, b2):
    """Host-side weight preprocessing (one-time, analogous to BN folding).

    w1 : (C, C2)        1x1 conv weight (channel matmul form)
    w2 : (3, 3, C2, C)  3x3 conv weight, HWIO
    s*, b* : folded BN scale / bias vectors
    """
    f32 = jnp.float32
    w1f = (w1 * s1[None, :]).astype(f32)                      # scale -> weights
    w2f = (w2 * s2[None, None, None, :]).astype(f32)

    # Block-diagonal 1x1 conv: (W*C, W*C2), W copies of w1f on the diagonal.
    w1_block = jnp.kron(jnp.eye(W, dtype=f32), w1f)

    # Banded 3x3 horizontal-tap matrices, one per vertical tap dy:
    #   M_dy[(w_in, ci), (w_out, co)] = w2f[dy, w_in - w_out + 1, ci, co]
    mats = []
    for dy in range(3):
        m = jnp.zeros((W * C2, W * C), f32)
        for dx in range(3):
            m = m + jnp.kron(jnp.eye(W, k=1 - dx, dtype=f32), w2f[dy, dx])
        mats.append(m)
    w2_band = jnp.stack(mats)                                 # (3, W*C2, W*C)

    # Vertical shift matrices over the fused (B*H) row axis. Zero at image
    # boundaries so no shifting leaks across batch elements.
    r = jnp.arange(B * H)
    up_mask = ((r % H) != 0).astype(f32)[:, None]
    dn_mask = ((r % H) != (H - 1)).astype(f32)[:, None]
    s_up = jnp.eye(B * H, k=-1, dtype=f32) * up_mask          # picks row h-1
    s_dn = jnp.eye(B * H, k=+1, dtype=f32) * dn_mask          # picks row h+1
    shifts = jnp.stack([s_up, s_dn])                          # (2, B*H, B*H)

    # Per-lane bias rows (bias tiled across W so it broadcasts over lane rows).
    b1_row = jnp.tile(b1.astype(f32), W)[None, :]             # (1, W*C2)
    b2_row = jnp.tile(b2.astype(f32), W)[None, :]             # (1, W*C)
    return w1_block, b1_row, shifts, w2_band, b2_row


def residual_forward(x, w1_block, b1_row, shifts, w2_band, b2_row):
    """x: (B, H, W, C) float32 -> (B, H, W, C) float32."""
    b, h, w, c = x.shape
    x2d = x.reshape(b * h, w * c)          # contiguous -> lane-dense (32, 128)
    bh, wc = x2d.shape
    wc2 = w1_block.shape[1]

    flops = 2 * (bh * wc * wc2            # conv1 block-diag matmul
                 + 2 * bh * bh * wc2      # two vertical shift matmuls
                 + 3 * bh * wc2 * wc)     # three banded conv2 matmuls
    bytes_accessed = 4 * (2 * x2d.size + w1_block.size + shifts.size
                          + w2_band.size + b1_row.size + b2_row.size)

    out2d = pl.pallas_call(
        residual_kernel,
        out_shape=jax.ShapeDtypeStruct(x2d.shape, x.dtype),
        grid_spec=pltpu.PrefetchScalarGridSpec(
            num_scalar_prefetch=0,
            grid=(1,),
            in_specs=[
                pl.BlockSpec((bh, wc), lambda i: (0, 0)),
                pl.BlockSpec(w1_block.shape, lambda i: (0, 0)),
                pl.BlockSpec(b1_row.shape, lambda i: (0, 0)),
                pl.BlockSpec(shifts.shape, lambda i: (0, 0, 0)),
                pl.BlockSpec(w2_band.shape, lambda i: (0, 0, 0)),
                pl.BlockSpec(b2_row.shape, lambda i: (0, 0)),
            ],
            out_specs=pl.BlockSpec((bh, wc), lambda i: (0, 0)),
        ),
        compiler_params=pltpu.CompilerParams(
            dimension_semantics=("arbitrary",)),
        cost_estimate=pl.CostEstimate(
            flops=flops, transcendentals=0, bytes_accessed=bytes_accessed),
    )(x2d, w1_block, b1_row, shifts, w2_band, b2_row)
    return out2d.reshape(b, h, w, c)


def _reference(x, w1, s1, b1, w2, s2, b2):
    """Pure-JAX reference (NHWC, HWIO convs) for correctness checking."""
    h = lax.conv_general_dilated(
        x, w1.reshape(1, 1, C, C2), (1, 1), "SAME",
        dimension_numbers=("NHWC", "HWIO", "NHWC"))
    h = _leaky(h * s1 + b1)
    h2 = lax.conv_general_dilated(
        h, w2, (1, 1), "SAME",
        dimension_numbers=("NHWC", "HWIO", "NHWC"))
    h2 = _leaky(h2 * s2 + b2)
    return h2 + x


if __name__ == "__main__":
    key = jax.random.PRNGKey(0)
    keys = jax.random.split(key, 12)

    # Input (NHWC) — equivalent to a PyTorch NCHW (2, 8, 16, 16) tensor.
    x = jax.random.normal(keys[0], (B, H, W, C), dtype=jnp.float32)

    # Conv weights, deterministic init.
    # Conv1: PyTorch OIHW (C2, C, 1, 1) -> stored as (C, C2) channel matmul.
    w1 = jax.random.normal(keys[1], (C, C2), dtype=jnp.float32) * 0.2
    # Conv2: PyTorch OIHW (C, C2, 3, 3) -> stored HWIO (3, 3, C2, C).
    w2 = jax.random.normal(keys[2], (3, 3, C2, C), dtype=jnp.float32) * 0.1

    # BatchNorm parameters (inference / running statistics).
    g1 = jax.random.uniform(keys[3], (C2,), minval=0.5, maxval=1.5)
    be1 = jax.random.normal(keys[4], (C2,)) * 0.1
    m1 = jax.random.normal(keys[5], (C2,)) * 0.1
    v1 = jax.random.uniform(keys[6], (C2,), minval=0.5, maxval=1.5)
    g2 = jax.random.uniform(keys[7], (C,), minval=0.5, maxval=1.5)
    be2 = jax.random.normal(keys[8], (C,)) * 0.1
    m2 = jax.random.normal(keys[9], (C,)) * 0.1
    v2 = jax.random.uniform(keys[10], (C,), minval=0.5, maxval=1.5)

    s1, b1 = _fold_bn(g1, be1, m1, v1)
    s2, b2 = _fold_bn(g2, be2, m2, v2)

    # Host-side weight packing (BN scale folded in, block-diag / banded mats).
    params = prepare_params(w1, w2, s1, b1, s2, b2)

    out = residual_forward(x, *params)
    out = jax.block_until_ready(out)

    ref = jax.block_until_ready(_reference(x, w1, s1, b1, w2, s2, b2))
    assert out.shape == x.shape and out.dtype == x.dtype
    err = jnp.max(jnp.abs(out - ref))
    assert jnp.allclose(out, ref, rtol=1e-4, atol=1e-4), f"max abs err = {err}"

    print("KERNEL_OK")
</pallas_src>

<mosaic_0001>
module attributes {stable_mosaic.version = 11 : i64} {
  func.func @residual_kernel(%arg0: i32, %arg1: memref<32x128xf32, #tpu.memory_space<vmem>>, %arg2: memref<128x64xf32, #tpu.memory_space<vmem>>, %arg3: memref<1x64xf32, #tpu.memory_space<vmem>>, %arg4: memref<2x32x32xf32, #tpu.memory_space<vmem>>, %arg5: memref<3x64x128xf32, #tpu.memory_space<vmem>>, %arg6: memref<1x128xf32, #tpu.memory_space<vmem>>, %arg7: memref<32x128xf32, #tpu.memory_space<vmem>>) attributes {dimension_semantics = [#tpu.dimension_semantics<arbitrary>], iteration_bounds = array<i64: 1>, scalar_prefetch = 0 : i64, scratch_operands = 0 : i64, tpu.core_type = #tpu.core_type<tc>, window_params = [{pipeline_mode = #tpu.pipeline_mode<synchronous>, transform_indices = @transform_0, window_bounds = array<i64: 32, 128>}, {pipeline_mode = #tpu.pipeline_mode<synchronous>, transform_indices = @transform_1, window_bounds = array<i64: 128, 64>}, {pipeline_mode = #tpu.pipeline_mode<synchronous>, transform_indices = @transform_2, window_bounds = array<i64: 1, 64>}, {pipeline_mode = #tpu.pipeline_mode<synchronous>, transform_indices = @transform_3, window_bounds = array<i64: 2, 32, 32>}, {pipeline_mode = #tpu.pipeline_mode<synchronous>, transform_indices = @transform_4, window_bounds = array<i64: 3, 64, 128>}, {pipeline_mode = #tpu.pipeline_mode<synchronous>, transform_indices = @transform_5, window_bounds = array<i64: 1, 128>}, {pipeline_mode = #tpu.pipeline_mode<synchronous>, transform_indices = @transform_6, window_bounds = array<i64: 32, 128>}]} {
    %c0 = arith.constant 0 : index
    %c0_0 = arith.constant 0 : index
    %0 = vector.load %arg1[%c0, %c0_0] : memref<32x128xf32, #tpu.memory_space<vmem>>, vector<32x128xf32>
    %c0_1 = arith.constant 0 : index
    %c0_2 = arith.constant 0 : index
    %1 = vector.load %arg2[%c0_1, %c0_2] : memref<128x64xf32, #tpu.memory_space<vmem>>, vector<128x64xf32>
    %cst = arith.constant dense<0.000000e+00> : vector<32x64xf32>
    %2 = tpu.matmul %0, %1, %cst {dimension_numbers = #tpu.dot_dimension_numbers<[1], [0], [0], [1], [0, 0, 1, 1], [], []>} : vector<32x128xf32>, vector<128x64xf32>, vector<32x64xf32> -> vector<32x64xf32>
    %c0_3 = arith.constant 0 : index
    %c0_4 = arith.constant 0 : index
    %3 = vector.load %arg3[%c0_3, %c0_4] : memref<1x64xf32, #tpu.memory_space<vmem>>, vector<1x64xf32>
    %4 = vector.broadcast %3 : vector<1x64xf32> to vector<32x64xf32>
    %5 = arith.addf %2, %4 : vector<32x64xf32>
    %cst_5 = arith.constant 0.000000e+00 : f32
    %6 = vector.broadcast %cst_5 : f32 to vector<32x64xf32>
    %7 = arith.cmpf ogt, %5, %6 : vector<32x64xf32>
    %cst_6 = arith.constant 1.000000e-01 : f32
    %8 = vector.broadcast %cst_6 : f32 to vector<32x64xf32>
    %9 = arith.mulf %8, %5 : vector<32x64xf32>
    %10 = arith.select %7, %5, %9 : vector<32x64xi1>, vector<32x64xf32>
    %c0_7 = arith.constant 0 : index
    %c0_8 = arith.constant 0 : index
    %c0_9 = arith.constant 0 : index
    %11 = vector.load %arg4[%c0_7, %c0_8, %c0_9] : memref<2x32x32xf32, #tpu.memory_space<vmem>>, vector<1x32x32xf32>
    %12 = vector.shape_cast %11 : vector<1x32x32xf32> to vector<32x32xf32>
    %cst_10 = arith.constant dense<0.000000e+00> : vector<32x64xf32>
    %13 = tpu.matmul %12, %10, %cst_10 {dimension_numbers = #tpu.dot_dimension_numbers<[1], [0], [0], [1], [0, 0, 1, 1], [], []>} : vector<32x32xf32>, vector<32x64xf32>, vector<32x64xf32> -> vector<32x64xf32>
    %c1 = arith.constant 1 : index
    %c0_11 = arith.constant 0 : index
    %c0_12 = arith.constant 0 : index
    %14 = vector.load %arg4[%c1, %c0_11, %c0_12] : memref<2x32x32xf32, #tpu.memory_space<vmem>>, vector<1x32x32xf32>
    %15 = vector.shape_cast %14 : vector<1x32x32xf32> to vector<32x32xf32>
    %cst_13 = arith.constant dense<0.000000e+00> : vector<32x64xf32>
    %16 = tpu.matmul %15, %10, %cst_13 {dimension_numbers = #tpu.dot_dimension_numbers<[1], [0], [0], [1], [0, 0, 1, 1], [], []>} : vector<32x32xf32>, vector<32x64xf32>, vector<32x64xf32> -> vector<32x64xf32>
    %c0_14 = arith.constant 0 : index
    %c0_15 = arith.constant 0 : index
    %c0_16 = arith.constant 0 : index
    %17 = vector.load %arg5[%c0_14, %c0_15, %c0_16] : memref<3x64x128xf32, #tpu.memory_space<vmem>>, vector<1x64x128xf32>
    %18 = vector.shape_cast %17 : vector<1x64x128xf32> to vector<64x128xf32>
    %cst_17 = arith.constant dense<0.000000e+00> : vector<32x128xf32>
    %19 = tpu.matmul %13, %18, %cst_17 {dimension_numbers = #tpu.dot_dimension_numbers<[1], [0], [0], [1], [0, 0, 1, 1], [], []>} : vector<32x64xf32>, vector<64x128xf32>, vector<32x128xf32> -> vector<32x128xf32>
    %c1_18 = arith.constant 1 : index
    %c0_19 = arith.constant 0 : index
    %c0_20 = arith.constant 0 : index
    %20 = vector.load %arg5[%c1_18, %c0_19, %c0_20] : memref<3x64x128xf32, #tpu.memory_space<vmem>>, vector<1x64x128xf32>
    %21 = vector.shape_cast %20 : vector<1x64x128xf32> to vector<64x128xf32>
    %cst_21 = arith.constant dense<0.000000e+00> : vector<32x128xf32>
    %22 = tpu.matmul %10, %21, %cst_21 {dimension_numbers = #tpu.dot_dimension_numbers<[1], [0], [0], [1], [0, 0, 1, 1], [], []>} : vector<32x64xf32>, vector<64x128xf32>, vector<32x128xf32> -> vector<32x128xf32>
    %23 = arith.addf %19, %22 : vector<32x128xf32>
    %c2 = arith.constant 2 : index
    %c0_22 = arith.constant 0 : index
    %c0_23 = arith.constant 0 : index
    %24 = vector.load %arg5[%c2, %c0_22, %c0_23] : memref<3x64x128xf32, #tpu.memory_space<vmem>>, vector<1x64x128xf32>
    %25 = vector.shape_cast %24 : vector<1x64x128xf32> to vector<64x128xf32>
    %cst_24 = arith.constant dense<0.000000e+00> : vector<32x128xf32>
    %26 = tpu.matmul %16, %25, %cst_24 {dimension_numbers = #tpu.dot_dimension_numbers<[1], [0], [0], [1], [0, 0, 1, 1], [], []>} : vector<32x64xf32>, vector<64x128xf32>, vector<32x128xf32> -> vector<32x128xf32>
    %27 = arith.addf %23, %26 : vector<32x128xf32>
    %c0_25 = arith.constant 0 : index
    %c0_26 = arith.constant 0 : index
    %28 = vector.load %arg6[%c0_25, %c0_26] : memref<1x128xf32, #tpu.memory_space<vmem>>, vector<1x128xf32>
    %29 = vector.broadcast %28 : vector<1x128xf32> to vector<32x128xf32>
    %30 = arith.addf %27, %29 : vector<32x128xf32>
    %cst_27 = arith.constant 0.000000e+00 : f32
    %31 = vector.broadcast %cst_27 : f32 to vector<32x128xf32>
    %32 = arith.cmpf ogt, %30, %31 : vector<32x128xf32>
    %cst_28 = arith.constant 1.000000e-01 : f32
    %33 = vector.broadcast %cst_28 : f32 to vector<32x128xf32>
    %34 = arith.mulf %33, %30 : vector<32x128xf32>
    %35 = arith.select %32, %30, %34 : vector<32x128xi1>, vector<32x128xf32>
    %36 = arith.addf %35, %0 : vector<32x128xf32>
    %c0_29 = arith.constant 0 : index
    %c0_30 = arith.constant 0 : index
    %37 = vector.load %arg7[%c0_29, %c0_30] : memref<32x128xf32, #tpu.memory_space<vmem>>, vector<32x128xf32>
    tpu.vector_store %arg7[%c0_29, %c0_30], %36 {strides = array<i32>} : memref<32x128xf32, #tpu.memory_space<vmem>>, vector<32x128xf32>,
    return
  }
  func.func @transform_0(%arg0: i32) -> (i32, i32) {
    %c0_i32 = arith.constant 0 : i32
    %c0_i32_0 = arith.constant 0 : i32
    %c0_i32_1 = arith.constant 0 : i32
    return %c0_i32, %c0_i32_0 : i32, i32
  }
  func.func @transform_1(%arg0: i32) -> (i32, i32) {
    %c0_i32 = arith.constant 0 : i32
    %c0_i32_0 = arith.constant 0 : i32
    %c0_i32_1 = arith.constant 0 : i32
    return %c0_i32, %c0_i32_0 : i32, i32
  }
  func.func @transform_2(%arg0: i32) -> (i32, i32) {
    %c0_i32 = arith.constant 0 : i32
    %c0_i32_0 = arith.constant 0 : i32
    %c0_i32_1 = arith.constant 0 : i32
    return %c0_i32, %c0_i32_0 : i32, i32
  }
  func.func @transform_3(%arg0: i32) -> (i32, i32, i32) {
    %c0_i32 = arith.constant 0 : i32
    %c0_i32_0 = arith.constant 0 : i32
    %c0_i32_1 = arith.constant 0 : i32
    %c0_i32_2 = arith.constant 0 : i32
    return %c0_i32, %c0_i32_0, %c0_i32_1 : i32, i32, i32
  }
  func.func @transform_4(%arg0: i32) -> (i32, i32, i32) {
    %c0_i32 = arith.constant 0 : i32
    %c0_i32_0 = arith.constant 0 : i32
    %c0_i32_1 = arith.constant 0 : i32
    %c0_i32_2 = arith.constant 0 : i32
    return %c0_i32, %c0_i32_0, %c0_i32_1 : i32, i32, i32
  }
  func.func @transform_5(%arg0: i32) -> (i32, i32) {
    %c0_i32 = arith.constant 0 : i32
    %c0_i32_0 = arith.constant 0 : i32
    %c0_i32_1 = arith.constant 0 : i32
    return %c0_i32, %c0_i32_0 : i32, i32
  }
  func.func @transform_6(%arg0: i32) -> (i32, i32) {
    %c0_i32 = arith.constant 0 : i32
    %c0_i32_0 = arith.constant 0 : i32
    %c0_i32_1 = arith.constant 0 : i32
    return %c0_i32, %c0_i32_0 : i32, i32
  }
}

</mosaic_0001>

<bundles_post_ra>
// kernel: tpu_custom_call.1
= control target key start
LH: loop header
LB: loop body
LE: loop exit
PB: predicated region body
PF: predicated region fallthrough
CT: control target
= control target key end

     0   :  { %11 = vsyncpa [#allocation3], 0  ;;  %s1298_s0 = inlined_call_operand.hbm [shape: f32[32,128], index: 0, kind: input, shape index: {}]   ;;  %s1299_s1 = inlined_call_operand.vmem [shape: f32[128,64], index: 1, kind: input, shape index: {}]   ;;  %s1300_s2 = inlined_call_operand.vmem [shape: f32[1,64], index: 2, kind: input, shape index: {}]   ;;  %s1301_s3 = inlined_call_operand.hbm [shape: f32[2,32,32], index: 3, kind: input, shape index: {}]   ;;  %s1302_s4 = inlined_call_operand.vmem [shape: f32[3,64,128], index: 4, kind: input, shape index: {}]   ;;  %s1303_s5 = inlined_call_operand.vmem [shape: f32[1,128], index: 5, kind: input, shape index: {}]   ;;  %s1304_s6 = inlined_call_operand.hbm [shape: f32[32,128], index: 6, kind: output, shape index: {}]  }
   0x1   :  { %12 = vsyncpa [#allocation6], 0 }
   0x2   :  { %13 = vsyncpa [#allocation4], 0  ;;  %s1064_s21 = smov [#allocation2]  }
   0x3   :  { %s19_s22 = sshll.u32 %s1064_s21, 4  ;;  %s20_s22 = int_to_ptr.vmem [resolvable:$true] %s19_s22 }
   0x4   :  { %s1006_s23 = scalar_lea.vmem %s20_s22, 512  ;;  %p1011_p1 = scmp.lt.s32.totalorder %s20_s22, %s20_s22 }
   0x5   :  { %p1007_p0 = scmp.ne.s32.totalorder %s20_s22, %s1006_s23  ;;  %p1012_p2 = scmp.lt.s32.totalorder %s1006_s23, %s1006_s23 }
   0x7   :  { %p1013_p3 = por %p1012_p2, %p1011_p1 }
   0x9   :  { %p1014_p4 = pnand %p1013_p3, %p1007_p0 }
   0xb   :  { %1017 = shalt.err (!%p1014_p4)
}
   0xc   :  { %s1065_s24 = smov 128   ;;  %s1066_s25 = smov 8  }
   0xd   :  { %25 = dma.hbm_to_vmem [thread:$0]  %s1298_s0, 512, %s20_s22, [#allocation3], %s1065_s24, %s1065_s24, %s1066_s25  }
   0xe   :  { %s1067_s28 = smov [#allocation5]  }
   0xf   :  { %s35_s29 = sshll.u32 %s1067_s28, 4  ;;  %s36_s29 = int_to_ptr.vmem [resolvable:$true] %s35_s29 }
  0x10   :  { %s1026_s30 = scalar_lea.vmem %s36_s29, 1024  ;;  %p1031_p6 = scmp.lt.s32.totalorder %s36_s29, %s36_s29 }
  0x11   :  { %p1027_p5 = scmp.ne.s32.totalorder %s36_s29, %s1026_s30  ;;  %p1032_p7 = scmp.lt.s32.totalorder %s1026_s30, %s1026_s30 }
  0x13   :  { %p1033_p8 = por %p1032_p7, %p1031_p6 }
  0x15   :  { %p1034_p9 = pnand %p1033_p8, %p1027_p5 }
  0x17   :  { %1037 = shalt.err (!%p1034_p9)
}
  0x18   :  { %41 = dma.hbm_to_vmem [thread:$0]  %s1301_s3, 1024, %s36_s29, [#allocation6], %s1065_s24, %s1065_s24, %s1066_s25  }
  0x19   :  { %1058 = dma.done.wait [#allocation3], 512  }
  0x1a   :  { %1059 = vsyncadd [#allocation3], 4294966784 }
  0x1b   :  { %1060 = dma.done.wait [#allocation6], 1024  }
  0x1c   :  { %1061 = vsyncadd [#allocation6], 4294966272  ;;  %v71_v0 = vld [vmem:[%s1299_s1 + $0x78] sm:$0xff]  ;;  %v70_v1 = vld [vmem:[%s1299_s1 + $0x70] sm:$0xff]  ;;  %vm180_vm0 = vcmask 261120   ;;  %vm397_vm5 = vcmask 523264  }
  0x1d   :  { %861 = vmatprep.subr.mxu0 %v71_v0  ;;  %v69_v2 = vld [vmem:[%s1299_s1 + $0x68] sm:$0xff]  ;;  %v68_v3 = vld [vmem:[%s1299_s1 + $0x60] sm:$0xff]  ;;  %v67_v5 = vld [vmem:[%s1299_s1 + $0x58] sm:$0xff] }
  0x1e   :  { %862 = vmatpush3.msra.mxu0 %v71_v0  ;;  %v1128_v4 = vld [vmem:[#allocation2] sm:$0xff]  ;;  %v66_v6 = vld [vmem:[%s1299_s1 + $0x50] sm:$0xff]  ;;  %v65_v7 = vld [vmem:[%s1299_s1 + $0x48] sm:$0xff] }
  0x1f   :  { %863 = vmatprep.subr.mxu0 %v70_v1  ;;  %893 = vmatprep.mubr.f32.mxu0 %v1128_v4  ;;  %v64_v8 = vld [vmem:[%s1299_s1 + $0x40] sm:$0xff]  ;;  %v63_v9 = vld [vmem:[%s1299_s1 + $0x38] sm:$0xff]  ;;  %v62_v10 = vld [vmem:[%s1299_s1 + $0x30] sm:$0xff] }
  0x20   :  { %864 = vmatpush3.msra.mxu0 %v70_v1  ;;  %v61_v11 = vld [vmem:[%s1299_s1 + $0x28] sm:$0xff]  ;;  %v60_v12 = vld [vmem:[%s1299_s1 + $0x20] sm:$0xff]  ;;  %v59_v13 = vld [vmem:[%s1299_s1 + $0x18] sm:$0xff] }
  0x21   :  { %865 = vmatprep.subr.mxu0 %v69_v2  ;;  %v58_v14 = vld [vmem:[%s1299_s1 + $0x10] sm:$0xff]  ;;  %v57_v15 = vld [vmem:[%s1299_s1 + $0x8] sm:$0xff]  ;;  %v56_v16 = vld [vmem:[%s1299_s1] sm:$0xff] }
  0x22   :  { %866 = vmatpush3.msra.mxu0 %v69_v2  ;;  %v1167_v17 = vld [vmem:[#allocation2 + $0x8] sm:$0xff]  ;;  %v1169_v18 = vld [vmem:[#allocation2 + $0x10] sm:$0xff]  ;;  %v1173_v19 = vld [vmem:[#allocation2 + $0x18] sm:$0xff] }
  0x23   :  { %867 = vmatprep.subr.mxu0 %v68_v3  ;;  %v176_v20 = vld [vmem:[#allocation5] sm:$0xff]  ;;  %v387_v21 = vld [vmem:[%s1302_s4 + $0x38] sm:$0xff]  ;;  %v386_v22 = vld [vmem:[%s1302_s4 + $0x30] sm:$0xff] }
  0x24   :  { %868 = vmatpush3.msra.mxu0 %v68_v3  ;;  %907 = vmatprep.mubr.msk.f32.mxu1 %vm180_vm0, %v176_v20  ;;  %v385_v23 = vld [vmem:[%s1302_s4 + $0x28] sm:$0xff]  ;;  %v384_v24 = vld [vmem:[%s1302_s4 + $0x20] sm:$0xff]  ;;  %v383_v25 = vld [vmem:[%s1302_s4 + $0x18] sm:$0xff] }
  0x25   :  { %869 = vmatprep.subr.mxu0 %v67_v5  ;;  %v382_v26 = vld [vmem:[%s1302_s4 + $0x10] sm:$0xff]  ;;  %v751_v28 = vld [vmem:[%s1300_s2] ss:$0 sm:$0xff]  ;;  %v177_v44 = vld [vmem:[#allocation5 + $0x8] sm:$0xff] }
  0x26   :  { %870 = vmatpush3.msra.mxu0 %v67_v5  ;;  %v178_v45 = vld [vmem:[#allocation5 + $0x10] sm:$0xff]  ;;  %v179_v46 = vld [vmem:[#allocation5 + $0x18] sm:$0xff]  ;;  %v279_v47 = vld [vmem:[#allocation5 + $0x20] sm:$0xff] }
  0x27   :  { %871 = vmatprep.subr.mxu0 %v66_v6  ;;  %v280_v48 = vld [vmem:[#allocation5 + $0x28] sm:$0xff]  ;;  %v767_v49 = vld [vmem:[%s1302_s4 + $0x78] sm:$0xff]  ;;  %v281_v50 = vld [vmem:[#allocation5 + $0x30] sm:$0xff] }
  0x28   :  { %872 = vmatpush3.msra.mxu0 %v66_v6  ;;  %v766_v51 = vld [vmem:[%s1302_s4 + $0x70] sm:$0xff]  ;;  %v282_v52 = vld [vmem:[#allocation5 + $0x38] sm:$0xff]  ;;  %v765_v53 = vld [vmem:[%s1302_s4 + $0x68] sm:$0xff] }
  0x29   :  { %873 = vmatprep.subr.mxu0 %v65_v7  ;;  %v764_v54 = vld [vmem:[%s1302_s4 + $0x60] sm:$0xff]  ;;  %v763_v55 = vld [vmem:[%s1302_s4 + $0x58] sm:$0xff]  ;;  %v762_v56 = vld [vmem:[%s1302_s4 + $0x50] sm:$0xff] }
  0x2a   :  { %874 = vmatpush3.msra.mxu0 %v65_v7  ;;  %v761_v57 = vld [vmem:[%s1302_s4 + $0x48] sm:$0xff]  ;;  %v760_v58 = vld [vmem:[%s1302_s4 + $0x40] sm:$0xff]  ;;  %v783_v59 = vld [vmem:[%s1302_s4 + $0xb8] sm:$0xff] }
  0x2b   :  { %875 = vmatprep.subr.mxu0 %v64_v8  ;;  %v782_v60 = vld [vmem:[%s1302_s4 + $0xb0] sm:$0xff]  ;;  %v381_v61 = vld [vmem:[%s1302_s4 + $0x8] sm:$0xff]  ;;  %v380_v63 = vld [vmem:[%s1302_s4] sm:$0xff] }
  0x2c   :  { %876 = vmatpush3.msra.mxu0 %v64_v8  ;;  %v781_v62 = vld [vmem:[%s1302_s4 + $0xa8] sm:$0xff]  ;;  %v780_v0 = vld [vmem:[%s1302_s4 + $0xa0] sm:$0xff]  ;;  %v779_v1 = vld [vmem:[%s1302_s4 + $0x98] sm:$0xff] }
  0x2d   :  { %877 = vmatprep.subr.mxu0 %v63_v9  ;;  %v778_v2 = vld [vmem:[%s1302_s4 + $0x90] sm:$0xff]  ;;  %v777_v3 = vld [vmem:[%s1302_s4 + $0x88] sm:$0xff]  ;;  %v776_v5 = vld [vmem:[%s1302_s4 + $0x80] sm:$0xff] }
  0x2e   :  { %878 = vmatpush3.msra.mxu0 %v63_v9 }
  0x2f   :  { %879 = vmatprep.subr.mxu0 %v62_v10 }
  0x30   :  { %880 = vmatpush3.msra.mxu0 %v62_v10 }
  0x31   :  { %881 = vmatprep.subr.mxu0 %v61_v11 }
  0x32   :  { %882 = vmatpush3.msra.mxu0 %v61_v11 }
  0x33   :  { %883 = vmatprep.subr.mxu0 %v60_v12 }
  0x34   :  { %884 = vmatpush3.msra.mxu0 %v60_v12 }
  0x35   :  { %885 = vmatprep.subr.mxu0 %v59_v13 }
  0x36   :  { %886 = vmatpush3.msra.mxu0 %v59_v13 }
  0x37   :  { %887 = vmatprep.subr.mxu0 %v58_v14 }
  0x38   :  { %888 = vmatpush3.msra.mxu0 %v58_v14 }
  0x39   :  { %889 = vmatprep.subr.mxu0 %v57_v15 }
  0x3a   :  { %890 = vmatpush3.msra.mxu0 %v57_v15 }
  0x3b   :  { %891 = vmatprep.subr.mxu0 %v56_v16 }
  0x3c   :  { %892 = vmatpush3.msra.mxu0 %v56_v16 }
  0x3d   :  { %894 = vmatmul.mubr.f32.vlgmr.msra.gmra.mxu0 %v1167_v17  ;;  %949 = vmatprep.subr.mxu0 %v387_v21 }
  0x3e   :  { %896 = vmatprep.mubr.f32.mxu0 %v1169_v18  ;;  %950 = vmatpush3.msra.mxu0 %v387_v21 }
  0x3f   :  { %951 = vmatprep.subr.mxu0 %v386_v22 }
  0x40   :  { %952 = vmatpush3.msra.mxu0 %v386_v22 }
  0x41   :  { %897 = vmatmul.mubr.f32.gmra.mxu0 %v1173_v19  ;;  %953 = vmatprep.subr.mxu0 %v385_v23 }
  0x42   :  { %954 = vmatpush3.msra.mxu0 %v385_v23 }
  0x43   :  { %955 = vmatprep.subr.mxu0 %v384_v24 }
  0x44   :  { %956 = vmatpush3.msra.mxu0 %v384_v24 }
  0x45   :  { %957 = vmatprep.subr.mxu0 %v383_v25 }
  0x46   :  { %958 = vmatpush3.msra.mxu0 %v383_v25 }
  0x47   :  { %959 = vmatprep.subr.mxu0 %v382_v26 }
  0x48   :  { %960 = vmatpush3.msra.mxu0 %v382_v26  ;;  %v788_v26 = vld [vmem:[%s1303_s5] ss:$0 sm:$0xff]  ;;  %s1068_s5 = smov [#allocation7]  }
  0x49   :  { %961 = vmatprep.subr.mxu0 %v381_v61  ;;  %s738_s14 = sshll.u32 %s1068_s5, 4  ;;  %s739_s14 = int_to_ptr.vmem [resolvable:$true] %s738_s14 }
  0x4a   :  { %962 = vmatpush3.msra.mxu0 %v381_v61  ;;  %s1038_s1 = scalar_lea.vmem %s739_s14, 512  ;;  %p1043_p11 = scmp.lt.s32.totalorder %s739_s14, %s739_s14 }
  0x4b   :  { %963 = vmatprep.subr.mxu0 %v380_v63  ;;  %p1039_p10 = scmp.ne.s32.totalorder %s739_s14, %s1038_s1  ;;  %p1044_p12 = scmp.lt.s32.totalorder %s1038_s1, %s1038_s1 }
  0x4c   :  { %964 = vmatpush3.msra.mxu0 %v380_v63 }
  0x4d   :  { %p1045_p13 = por %p1044_p12, %p1043_p11 }
  0x4f   :  { %p1046_p0 = pnand %p1045_p13, %p1039_p10 }
  0xfd   :  { %v895_v27 = vpop.f32.mrf.mxu0 }
  0xfe   :  { %v151_v31 = vadd.f32 %v895_v27, %v751_v28 }
  0xff   :  { %v145_v29 = vpop.f32.mrf.mxu0 }
 0x100   :  { %v146_v34 = vadd.f32 %v751_v28, %v145_v29  ;;  %v169_v37 = vmul.f32 0.1, %v151_v31  ;;  %vm165_vm3 = vcmp.gt.f32.partialorder %v151_v31, 0.0 }
 0x101   :  { %v898_v30 = vpop.f32.mrf.mxu0 }
 0x102   :  { %v161_v32 = vadd.f32 %v898_v30, %v751_v28  ;;  %v168_v40 = vmul.f32 0.1, %v146_v34  ;;  %vm164_vm4 = vcmp.gt.f32.partialorder %v146_v34, 0.0  ;;  %v173_v42 = vsel %vm165_vm3, %v151_v31, %v169_v37 }
 0x103   :  { %v155_v33 = vpop.f32.mrf.mxu0 }
 0x104   :  { %vm167_vm1 = vcmp.gt.f32.partialorder %v161_v32, 0.0  ;;  %v171_v35 = vmul.f32 0.1, %v161_v32  ;;  %v156_v36 = vadd.f32 %v751_v28, %v155_v33  ;;  %v172_v43 = vsel %vm164_vm4, %v146_v34, %v168_v40 }
 0x106   :  { %v1198_v38 = vsel %vm167_vm1, %v161_v32, %v171_v35  ;;  %vm166_vm2 = vcmp.gt.f32.partialorder %v156_v36, 0.0  ;;  %v170_v39 = vmul.f32 0.1, %v156_v36 }
 0x107   :  { %899 = vmatprep.subr.mxu1 %v1198_v38 }
 0x108   :  { %v1201_v41 = vsel %vm166_vm2, %v156_v36, %v170_v39  ;;  %900 = vmatpush3.msra.mxu1 %v1198_v38 }
 0x109   :  { %901 = vmatprep.subr.mxu1 %v1201_v41 }
 0x10a   :  { %902 = vmatpush3.msra.mxu1 %v1201_v41 }
 0x10b   :  { %903 = vmatprep.subr.mxu1 %v173_v42 }
 0x10c   :  { %904 = vmatpush3.msra.mxu1 %v173_v42 }
 0x10d   :  { %905 = vmatprep.subr.mxu1 %v172_v43 }
 0x10e   :  { %906 = vmatpush3.msra.mxu1 %v172_v43 }
 0x10f   :  { %908 = vmatmul.mubr.msk.f32.vlgmr.msra.gmra.mxu1 %vm180_vm0, %v177_v44  ;;  %913 = vmatprep.subr.mxu1 %v1198_v38 }
 0x110   :  { %914 = vmatpush3.msra.mxu1 %v1198_v38  ;;  %910 = vmatprep.mubr.msk.f32.mxu1 %vm180_vm0, %v178_v45 }
 0x111   :  { %915 = vmatprep.subr.mxu1 %v1201_v41 }
 0x112   :  { %916 = vmatpush3.msra.mxu1 %v1201_v41 }
 0x113   :  { %911 = vmatmul.mubr.msk.f32.gmra.mxu1 %vm180_vm0, %v179_v46  ;;  %917 = vmatprep.subr.mxu1 %v173_v42 }
 0x114   :  { %918 = vmatpush3.msra.mxu1 %v173_v42  ;;  %921 = vmatprep.mubr.msk.f32.mxu1 %vm180_vm0, %v279_v47 }
 0x115   :  { %919 = vmatprep.subr.mxu1 %v172_v43 }
 0x116   :  { %920 = vmatpush3.msra.mxu1 %v172_v43 }
 0x117   :  { %922 = vmatmul.mubr.msk.f32.vlgmr.msra.gmra.mxu1 %vm180_vm0, %v280_v48  ;;  %927 = vmatprep.subr.mxu1 %v767_v49 }
 0x118   :  { %928 = vmatpush3.msra.mxu1 %v767_v49  ;;  %924 = vmatprep.mubr.msk.f32.mxu1 %vm180_vm0, %v281_v50 }
 0x119   :  { %929 = vmatprep.subr.mxu1 %v766_v51 }
 0x11a   :  { %930 = vmatpush3.msra.mxu1 %v766_v51 }
 0x11b   :  { %925 = vmatmul.mubr.msk.f32.gmra.mxu1 %vm180_vm0, %v282_v52  ;;  %931 = vmatprep.subr.mxu1 %v765_v53 }
 0x11c   :  { %932 = vmatpush3.msra.mxu1 %v765_v53  ;;  %943 = vmatprep.mubr.msk.f32.mxu1 %vm397_vm5, %v172_v43 }
 0x11d   :  { %933 = vmatprep.subr.mxu1 %v764_v54 }
 0x11e   :  { %934 = vmatpush3.msra.mxu1 %v764_v54 }
 0x11f   :  { %935 = vmatprep.subr.mxu1 %v763_v55 }
 0x120   :  { %936 = vmatpush3.msra.mxu1 %v763_v55 }
 0x121   :  { %937 = vmatprep.subr.mxu1 %v762_v56 }
 0x122   :  { %938 = vmatpush3.msra.mxu1 %v762_v56 }
 0x123   :  { %939 = vmatprep.subr.mxu1 %v761_v57 }
 0x124   :  { %940 = vmatpush3.msra.mxu1 %v761_v57 }
 0x125   :  { %941 = vmatprep.subr.mxu1 %v760_v58 }
 0x126   :  { %942 = vmatpush3.msra.mxu1 %v760_v58 }
 0x127   :  { %944 = vmatmul.mubr.msk.f32.vlgmr.msra.gmra.mxu1 %vm397_vm5, %v173_v42  ;;  %971 = vmatprep.subr.mxu1 %v783_v59 }
 0x128   :  { %946 = vmatprep.mubr.msk.f32.mxu1 %vm397_vm5, %v1201_v41  ;;  %972 = vmatpush3.msra.mxu1 %v783_v59 }
 0x129   :  { %973 = vmatprep.subr.mxu1 %v782_v60 }
 0x12a   :  { %974 = vmatpush3.msra.mxu1 %v782_v60 }
 0x12b   :  { %947 = vmatmul.mubr.msk.f32.gmra.mxu1 %vm397_vm5, %v1198_v38  ;;  %975 = vmatprep.subr.mxu1 %v781_v62 }
 0x12c   :  { %976 = vmatpush3.msra.mxu1 %v781_v62 }
 0x12d   :  { %977 = vmatprep.subr.mxu1 %v780_v0 }
 0x12e   :  { %978 = vmatpush3.msra.mxu1 %v780_v0 }
 0x12f   :  { %979 = vmatprep.subr.mxu1 %v779_v1 }
 0x130   :  { %980 = vmatpush3.msra.mxu1 %v779_v1 }
 0x131   :  { %981 = vmatprep.subr.mxu1 %v778_v2 }
 0x132   :  { %982 = vmatpush3.msra.mxu1 %v778_v2 }
 0x133   :  { %983 = vmatprep.subr.mxu1 %v777_v3 }
 0x134   :  { %984 = vmatpush3.msra.mxu1 %v777_v3 }
 0x135   :  { %985 = vmatprep.subr.mxu1 %v776_v5 }
 0x136   :  { %986 = vmatpush3.msra.mxu1 %v776_v5 }
 0x1cf   :  { %v909_v6 = vpop.f32.mrf.mxu1 }
 0x1d1   :  { %v259_v7 = vpop.f32.mrf.mxu1 }
 0x1d2   :  { %965 = vmatprep.mubr.msk.f32.mxu0 %vm397_vm5, %v259_v7 }
 0x1d3   :  { %v912_v8 = vpop.f32.mrf.mxu1  ;;  %966 = vmatmul.mubr.msk.f32.vlgmr.msra.gmra.mxu0 %vm397_vm5, %v909_v6 }
 0x1d5   :  { %v269_v9 = vpop.f32.mrf.mxu1 }
 0x1d6   :  { %968 = vmatprep.mubr.msk.f32.mxu0 %vm397_vm5, %v269_v9 }
 0x1d7   :  { %v923_v10 = vpop.f32.mrf.mxu1  ;;  %969 = vmatmul.mubr.msk.f32.gmra.mxu0 %vm397_vm5, %v912_v8 }
 0x1d9   :  { %v361_v11 = vpop.f32.mrf.mxu1 }
 0x1da   :  { %987 = vmatprep.mubr.msk.f32.mxu1 %vm397_vm5, %v361_v11 }
 0x1db   :  { %v926_v12 = vpop.f32.mrf.mxu1  ;;  %988 = vmatmul.mubr.msk.f32.vlgmr.msra.gmra.mxu1 %vm397_vm5, %v923_v10 }
 0x1dd   :  { %v371_v13 = vpop.f32.mrf.mxu1 }
 0x1de   :  { %990 = vmatprep.mubr.msk.f32.mxu1 %vm397_vm5, %v371_v13 }
 0x1df   :  { %991 = vmatmul.mubr.msk.f32.gmra.mxu1 %vm397_vm5, %v926_v12 }
 0x1e7   :  { %v945_v14 = vpop.f32.mrf.mxu1 }
 0x1e9   :  { %v476_v15 = vpop.f32.mrf.mxu1 }
 0x1eb   :  { %v948_v20 = vpop.f32.mrf.mxu1 }
 0x1ed   :  { %v486_v22 = vpop.f32.mrf.mxu1 }
 0x293   :  { %v967_v16 = vpop.f32.mrf.mxu0 }
 0x294   :  { %v579_v23 = vadd.f32 %v967_v16, %v945_v14 }
 0x295   :  { %v573_v21 = vpop.f32.mrf.mxu0 }
 0x296   :  { %v574_v27 = vadd.f32 %v573_v21, %v476_v15 }
 0x297   :  { %v970_v24 = vpop.f32.mrf.mxu0 }
 0x298   :  { %v589_v30 = vadd.f32 %v970_v24, %v948_v20 }
 0x299   :  { %v583_v31 = vpop.f32.mrf.mxu0 }
 0x29a   :  { %v584_v38 = vadd.f32 %v583_v31, %v486_v22 }
 0x29b   :  { %v989_v25 = vpop.f32.mrf.mxu1 }
 0x29c   :  { %v699_v28 = vadd.f32 %v989_v25, %v579_v23 }
 0x29d   :  { %v679_v29 = vpop.f32.mrf.mxu1 }
 0x29e   :  { %v710_v32 = vadd.f32 %v788_v26, %v699_v28  ;;  %v698_v33 = vadd.f32 %v679_v29, %v574_v27 }
 0x29f   :  { %v992_v34 = vpop.f32.mrf.mxu1 }
 0x2a0   :  { %vm714_vm6 = vcmp.gt.f32.partialorder %v710_v32, 0.0  ;;  %v718_v35 = vmul.f32 0.1, %v710_v32  ;;  %v709_v36 = vadd.f32 %v788_v26, %v698_v33  ;;  %v701_v37 = vadd.f32 %v992_v34, %v589_v30 }
 0x2a1   :  { %v689_v39 = vpop.f32.mrf.mxu1 }
 0x2a2   :  { %v722_v40 = vsel %vm714_vm6, %v710_v32, %v718_v35  ;;  %vm713_vm7 = vcmp.gt.f32.partialorder %v709_v36, 0.0  ;;  %v717_v41 = vmul.f32 0.1, %v709_v36  ;;  %v712_v42 = vadd.f32 %v788_v26, %v701_v37 }
 0x2a3   :  { %v726_v43 = vadd.f32 %v722_v40, %v1167_v17  ;;  %v700_v44 = vadd.f32 %v689_v39, %v584_v38 }
 0x2a4   :  { %v721_v45 = vsel %vm713_vm7, %v709_v36, %v717_v41  ;;  %vm716_vm8 = vcmp.gt.f32.partialorder %v712_v42, 0.0  ;;  %v720_v46 = vmul.f32 0.1, %v712_v42 }
 0x2a5   :  { %730 = vst [vmem:[#allocation7 + $0x8] sm:$0xff] %v726_v43  ;;  %v725_v47 = vadd.f32 %v721_v45, %v1128_v4  ;;  %v711_v48 = vadd.f32 %v788_v26, %v700_v44 }
 0x2a6   :  { %v724_v49 = vsel %vm716_vm8, %v712_v42, %v720_v46 }
 0x2a7   :  { %729 = vst [vmem:[#allocation7] sm:$0xff] %v725_v47  ;;  %v728_v50 = vadd.f32 %v724_v49, %v1173_v19  ;;  %vm715_vm9 = vcmp.gt.f32.partialorder %v711_v48, 0.0  ;;  %v719_v51 = vmul.f32 0.1, %v711_v48 }
 0x2a9   :  { %732 = vst [vmem:[#allocation7 + $0x18] sm:$0xff] %v728_v50  ;;  %v723_v52 = vsel %vm715_vm9, %v711_v48, %v719_v51 }
 0x2aa   :  { %v727_v17 = vadd.f32 %v723_v52, %v1169_v18 }
 0x2ac   :  { %731 = vst [vmem:[#allocation7 + $0x10] sm:$0xff] %v727_v17 }
 0x2ad   :  { %1049 = shalt.err (!%p1046_p0)
}
 0x2ae   :  { %744 = dma.vmem_to_hbm [thread:$0]  %s739_s14, 512, %s1304_s6, [#allocation4], %s1065_s24, %s1065_s24, %s1066_s25  }
 0x2af   :  { %1062 = dma.done.wait [#allocation4], 512  }
 0x2b0   :  { %1063 = vsyncadd [#allocation4], 4294966784 }
 0x2b1   :  { %748 = vsyncpa [#allocation3], 1 }
 0x2b2   :  { %749 = vsyncpa [#allocation6], 1 }
 0x2b3   :  { %750 = vsyncpa [#allocation4], 1 }

</bundles_post_ra>
